<compile_context>
chip_gen: v7x
topology: tpu7x:2x2x1
jax: 0.10.0
libtpu: 0.0.40
codegen_flags: <defaults>
</compile_context>

<pallas_src>
import math
from functools import partial

import jax
import jax.numpy as jnp
from jax.experimental import pallas as pl
from jax.experimental.pallas import tpu as pltpu

N_LAYERS = 9          # 9 Linear layers
N_NORMS = 8           # 8 LayerNorm(+Tanh) blocks after layers 1..8
LN_EPS = 1e-5


def _round_up(a, m):
    return (a + m - 1) // m * m


def _mlp_kernel(x_ref, w1_ref, wh_ref, w9b_ref, lnp_ref, o_ref,
                *, hidden, bias_row, mm_dtype):
    """Whole 9-layer MLP for one (tb, in) batch tile.

    Params are whole-array VMEM blocks (constant index_maps): DMA'd once,
    resident across all grid steps.
    """
    h = x_ref[...].astype(jnp.float32)

    def linear_ln_tanh(h, w, i):
        # Linear on the MXU; operands optionally bf16, accumulate in f32.
        h = jnp.dot(h.astype(mm_dtype), w.astype(mm_dtype),
                    preferred_element_type=jnp.float32)
        h = h + lnp_ref[0, i:i + 1, :]                      # Linear bias
        # Single-pass LayerNorm statistics (two independent reductions).
        mean = jnp.mean(h, axis=-1, keepdims=True)
        mean_sq = jnp.mean(h * h, axis=-1, keepdims=True)
        var = jnp.maximum(mean_sq - mean * mean, 0.0)
        h = (h - mean) * jax.lax.rsqrt(var + LN_EPS)
        h = h * lnp_ref[1, i:i + 1, :] + lnp_ref[2, i:i + 1, :]   # gamma, beta
        return jnp.tanh(h)                                  # EUP

    # Layer 1: (tb, in) @ (in, H)
    h = linear_ln_tanh(h, w1_ref[...], 0)
    # Layers 2..8: (tb, H) @ (H, H), weights statically indexed from the stack.
    for i in range(N_NORMS - 1):
        h = linear_ln_tanh(h, wh_ref[i], i + 1)

    # Layer 9: final Linear (no norm / activation), lane-padded output slab.
    w9 = w9b_ref[0:hidden, :]                    # aligned static slice
    b9 = w9b_ref[bias_row:bias_row + 1, :]       # 8-aligned bias row
    out = jnp.dot(h.astype(mm_dtype), w9.astype(mm_dtype),
                  preferred_element_type=jnp.float32) + b9
    o_ref[...] = out.astype(o_ref.dtype)


def pack_params(weights, biases, gammas, betas, *, out_lane_pad=128):
    """Host-side packing: 35 tensors -> 4 slabs. Do once per model, reuse."""
    in_size, hidden = weights[0].shape
    out_size = weights[-1].shape[1]
    out_pad = _round_up(out_size, out_lane_pad)
    bias_row = _round_up(hidden, 8)

    w1 = weights[0]                                       # (in, H)
    wh = jnp.stack(weights[1:N_LAYERS - 1], axis=0)       # (7, H, H)

    # Layer-9 weight + bias folded into one lane-dense slab.
    w9b = jnp.zeros((bias_row + 8, out_pad), jnp.float32)
    w9b = w9b.at[:hidden, :out_size].set(weights[-1])
    w9b = w9b.at[bias_row, :out_size].set(biases[-1])

    # [bias | gamma | beta] per norm block, each an (8, H) slab -> aligned rows.
    lnp = jnp.stack([jnp.stack(biases[:N_NORMS], axis=0),
                     jnp.stack(gammas, axis=0),
                     jnp.stack(betas, axis=0)], axis=0)    # (3, 8, H)

    meta = dict(in_size=in_size, hidden=hidden, out_size=out_size,
                out_pad=out_pad, bias_row=bias_row)
    return (w1, wh, w9b, lnp), meta


def mlp_controller_forward(x, packed, meta, *, matmul_dtype=jnp.float32,
                           batch_tile=128):
    """x: (..., in_size). All leading dims are fused into one pallas_call."""
    w1, wh, w9b, lnp = packed
    in_size, hidden = meta["in_size"], meta["hidden"]
    out_size, out_pad, bias_row = meta["out_size"], meta["out_pad"], meta["bias_row"]

    lead = x.shape[:-1]
    x2 = x.reshape(-1, in_size)
    n = x2.shape[0]
    # Batch tile: sublane-aligned; large batches stream in 128-row tiles.
    tb = batch_tile if n >= batch_tile else _round_up(n, 8)
    n_pad = _round_up(n, tb)
    if n_pad != n:
        x2 = jnp.pad(x2, ((0, n_pad - n), (0, 0)))
    grid = (n_pad // tb,)

    kernel = partial(_mlp_kernel, hidden=hidden, bias_row=bias_row,
                     mm_dtype=matmul_dtype)

    flops = 2 * n_pad * (in_size * hidden
                         + (N_NORMS - 1) * hidden * hidden
                         + hidden * out_pad)
    transcendentals = N_NORMS * n_pad * (hidden + 1)       # tanh + rsqrt
    bytes_accessed = 4 * (x2.size + w1.size + wh.size + w9b.size + lnp.size
                          + n_pad * out_pad)

    # NOTE(v7x): at production H, budget VMEM (9 f32 HxH layers ~= 36*(H/1024)^2
    # MiB + activations); beyond H~1024 set vmem_limit_bytes / use bf16 weights
    # or a per-layer grid instead of whole-array residency.
    out = pl.pallas_call(
        kernel,
        out_shape=jax.ShapeDtypeStruct((n_pad, out_pad), x.dtype),
        grid=grid,
        in_specs=[
            pl.BlockSpec((tb, in_size), lambda b: (b, 0)),    # streamed batch tiles
            pl.BlockSpec(w1.shape, lambda b: (0, 0)),         # params: constant
            pl.BlockSpec(wh.shape, lambda b: (0, 0, 0)),      # index maps ->
            pl.BlockSpec(w9b.shape, lambda b: (0, 0)),        # DMA once,
            pl.BlockSpec(lnp.shape, lambda b: (0, 0, 0)),     # VMEM-resident
        ],
        out_specs=pl.BlockSpec((tb, out_pad), lambda b: (b, 0)),
        compiler_params=pltpu.CompilerParams(
            dimension_semantics=("parallel",)),               # megacore on v7x
        cost_estimate=pl.CostEstimate(flops=flops,
                                      transcendentals=transcendentals,
                                      bytes_accessed=bytes_accessed),
    )(x2, w1, wh, w9b, lnp)

    return out[:n, :out_size].reshape(lead + (out_size,))


def _xavier_uniform(key, fan_in, fan_out):
    # Matches torch.nn.init.xavier_uniform_ (gain=1.0); stored as (in, out),
    # i.e. the transpose of PyTorch's (out, in); distribution identical.
    bound = math.sqrt(6.0 / (fan_in + fan_out))
    return jax.random.uniform(key, (fan_in, fan_out), jnp.float32,
                              minval=-bound, maxval=bound)


def make_params(key, input_size, hidden_size, output_size):
    dims = [input_size] + [hidden_size] * 8 + [output_size]
    keys = jax.random.split(key, N_LAYERS)
    weights = [_xavier_uniform(keys[i], dims[i], dims[i + 1])
               for i in range(N_LAYERS)]
    biases = [jnp.zeros((dims[i + 1],), jnp.float32) for i in range(N_LAYERS)]
    gammas = [jnp.ones((hidden_size,), jnp.float32) for _ in range(N_NORMS)]
    betas = [jnp.zeros((hidden_size,), jnp.float32) for _ in range(N_NORMS)]
    return weights, biases, gammas, betas


def _reference_forward(x, weights, biases, gammas, betas):
    """Pure-JAX, PyTorch-faithful reference (two-pass LayerNorm)."""
    h = x
    for i in range(N_NORMS):
        h = h @ weights[i] + biases[i]
        mean = jnp.mean(h, axis=-1, keepdims=True)
        var = jnp.mean((h - mean) ** 2, axis=-1, keepdims=True)
        h = (h - mean) / jnp.sqrt(var + LN_EPS) * gammas[i] + betas[i]
        h = jnp.tanh(h)
    return h @ weights[-1] + biases[-1]


if __name__ == "__main__":
    key = jax.random.PRNGKey(0)
    k_param, k_x, k_traj = jax.random.split(key, 3)

    batch = 8
    input_size = 16
    hidden_size = 32
    output_size = 8

    weights, biases, gammas, betas = make_params(
        k_param, input_size, hidden_size, output_size)
    packed, meta = pack_params(weights, biases, gammas, betas)

    # Single forward pass.
    x = jax.random.normal(k_x, (batch, input_size), jnp.float32)
    out = jax.block_until_ready(mlp_controller_forward(x, packed, meta))
    ref = _reference_forward(x, weights, biases, gammas, betas)
    assert out.shape == (batch, output_size)
    assert jnp.allclose(out, ref, atol=1e-4, rtol=1e-4)

    # Amortized rollout: T controller evaluations fused into ONE pallas_call
    # (params DMA'd once; batch tiles streamed over the grid).
    T = 4
    xs = jax.random.normal(k_traj, (T, batch, input_size), jnp.float32)
    outs = jax.block_until_ready(mlp_controller_forward(xs, packed, meta))
    refs = _reference_forward(xs.reshape(-1, input_size),
                              weights, biases, gammas, betas)
    assert outs.shape == (T, batch, output_size)
    assert jnp.allclose(outs, refs.reshape(T, batch, output_size),
                        atol=1e-4, rtol=1e-4)

    print("KERNEL_OK")
</pallas_src>

<mosaic_0001>
module attributes {stable_mosaic.version = 11 : i64} {
  func.func @_mlp_kernel(%arg0: i32, %arg1: memref<8x16xf32, #tpu.memory_space<vmem>>, %arg2: memref<16x32xf32, #tpu.memory_space<vmem>>, %arg3: memref<7x32x32xf32, #tpu.memory_space<vmem>>, %arg4: memref<40x128xf32, #tpu.memory_space<vmem>>, %arg5: memref<3x8x32xf32, #tpu.memory_space<vmem>>, %arg6: memref<8x128xf32, #tpu.memory_space<vmem>>) attributes {dimension_semantics = [#tpu.dimension_semantics<parallel>], iteration_bounds = array<i64: 1>, scalar_prefetch = 0 : i64, scratch_operands = 0 : i64, tpu.core_type = #tpu.core_type<tc>, window_params = [{transform_indices = @transform_0, window_bounds = array<i64: 8, 16>}, {pipeline_mode = #tpu.pipeline_mode<synchronous>, transform_indices = @transform_1, window_bounds = array<i64: 16, 32>}, {pipeline_mode = #tpu.pipeline_mode<synchronous>, transform_indices = @transform_2, window_bounds = array<i64: 7, 32, 32>}, {pipeline_mode = #tpu.pipeline_mode<synchronous>, transform_indices = @transform_3, window_bounds = array<i64: 40, 128>}, {pipeline_mode = #tpu.pipeline_mode<synchronous>, transform_indices = @transform_4, window_bounds = array<i64: 3, 8, 32>}, {transform_indices = @transform_5, window_bounds = array<i64: 8, 128>}]} {
    %c0 = arith.constant 0 : index
    %c0_0 = arith.constant 0 : index
    %0 = vector.load %arg1[%c0, %c0_0] : memref<8x16xf32, #tpu.memory_space<vmem>>, vector<8x16xf32>
    %c0_1 = arith.constant 0 : index
    %c0_2 = arith.constant 0 : index
    %1 = vector.load %arg2[%c0_1, %c0_2] : memref<16x32xf32, #tpu.memory_space<vmem>>, vector<16x32xf32>
    %cst = arith.constant dense<0.000000e+00> : vector<8x32xf32>
    %2 = tpu.matmul %0, %1, %cst {dimension_numbers = #tpu.dot_dimension_numbers<[1], [0], [0], [1], [0, 0, 1, 1], [], []>} : vector<8x16xf32>, vector<16x32xf32>, vector<8x32xf32> -> vector<8x32xf32>
    %c0_3 = arith.constant 0 : index
    %c0_4 = arith.constant 0 : index
    %c0_5 = arith.constant 0 : index
    %3 = vector.load %arg5[%c0_3, %c0_4, %c0_5] : memref<3x8x32xf32, #tpu.memory_space<vmem>>, vector<1x1x32xf32>
    %4 = vector.shape_cast %3 : vector<1x1x32xf32> to vector<1x32xf32>
    %5 = vector.broadcast %4 : vector<1x32xf32> to vector<8x32xf32>
    %6 = arith.addf %2, %5 : vector<8x32xf32>
    %cst_6 = arith.constant dense<0.000000e+00> : vector<8xf32>
    %7 = vector.multi_reduction <add>, %6, %cst_6 [1] : vector<8x32xf32> to vector<8xf32>
    %8 = vector.shape_cast %7 : vector<8xf32> to vector<8x1xf32>
    %cst_7 = arith.constant 3.200000e+01 : f32
    %9 = vector.broadcast %cst_7 : f32 to vector<8x1xf32>
    %10 = arith.divf %8, %9 : vector<8x1xf32>
    %11 = arith.mulf %6, %6 : vector<8x32xf32>
    %cst_8 = arith.constant dense<0.000000e+00> : vector<8xf32>
    %12 = vector.multi_reduction <add>, %11, %cst_8 [1] : vector<8x32xf32> to vector<8xf32>
    %13 = vector.shape_cast %12 : vector<8xf32> to vector<8x1xf32>
    %cst_9 = arith.constant 3.200000e+01 : f32
    %14 = vector.broadcast %cst_9 : f32 to vector<8x1xf32>
    %15 = arith.divf %13, %14 : vector<8x1xf32>
    %16 = arith.mulf %10, %10 : vector<8x1xf32>
    %17 = arith.subf %15, %16 : vector<8x1xf32>
    %cst_10 = arith.constant 0.000000e+00 : f32
    %18 = vector.broadcast %cst_10 : f32 to vector<8x1xf32>
    %19 = arith.maximumf %17, %18 : vector<8x1xf32>
    %20 = vector.broadcast %10 : vector<8x1xf32> to vector<8x32xf32>
    %21 = arith.subf %6, %20 : vector<8x32xf32>
    %cst_11 = arith.constant 9.99999974E-6 : f32
    %22 = vector.broadcast %cst_11 : f32 to vector<8x1xf32>
    %23 = arith.addf %19, %22 : vector<8x1xf32>
    %24 = math.rsqrt %23 : vector<8x1xf32>
    %25 = vector.broadcast %24 : vector<8x1xf32> to vector<8x32xf32>
    %26 = arith.mulf %21, %25 : vector<8x32xf32>
    %c1 = arith.constant 1 : index
    %c0_12 = arith.constant 0 : index
    %c0_13 = arith.constant 0 : index
    %27 = vector.load %arg5[%c1, %c0_12, %c0_13] : memref<3x8x32xf32, #tpu.memory_space<vmem>>, vector<1x1x32xf32>
    %28 = vector.shape_cast %27 : vector<1x1x32xf32> to vector<1x32xf32>
    %29 = vector.broadcast %28 : vector<1x32xf32> to vector<8x32xf32>
    %30 = arith.mulf %26, %29 : vector<8x32xf32>
    %c2 = arith.constant 2 : index
    %c0_14 = arith.constant 0 : index
    %c0_15 = arith.constant 0 : index
    %31 = vector.load %arg5[%c2, %c0_14, %c0_15] : memref<3x8x32xf32, #tpu.memory_space<vmem>>, vector<1x1x32xf32>
    %32 = vector.shape_cast %31 : vector<1x1x32xf32> to vector<1x32xf32>
    %33 = vector.broadcast %32 : vector<1x32xf32> to vector<8x32xf32>
    %34 = arith.addf %30, %33 : vector<8x32xf32>
    %35 = math.tanh %34 : vector<8x32xf32>
    %c0_16 = arith.constant 0 : index
    %c0_17 = arith.constant 0 : index
    %c0_18 = arith.constant 0 : index
    %36 = vector.load %arg3[%c0_16, %c0_17, %c0_18] : memref<7x32x32xf32, #tpu.memory_space<vmem>>, vector<1x32x32xf32>
    %37 = vector.shape_cast %36 : vector<1x32x32xf32> to vector<32x32xf32>
    %cst_19 = arith.constant dense<0.000000e+00> : vector<8x32xf32>
    %38 = tpu.matmul %35, %37, %cst_19 {dimension_numbers = #tpu.dot_dimension_numbers<[1], [0], [0], [1], [0, 0, 1, 1], [], []>} : vector<8x32xf32>, vector<32x32xf32>, vector<8x32xf32> -> vector<8x32xf32>
    %c0_20 = arith.constant 0 : index
    %c1_21 = arith.constant 1 : index
    %c0_22 = arith.constant 0 : index
    %39 = vector.load %arg5[%c0_20, %c1_21, %c0_22] : memref<3x8x32xf32, #tpu.memory_space<vmem>>, vector<1x1x32xf32>
    %40 = vector.shape_cast %39 : vector<1x1x32xf32> to vector<1x32xf32>
    %41 = vector.broadcast %40 : vector<1x32xf32> to vector<8x32xf32>
    %42 = arith.addf %38, %41 : vector<8x32xf32>
    %cst_23 = arith.constant dense<0.000000e+00> : vector<8xf32>
    %43 = vector.multi_reduction <add>, %42, %cst_23 [1] : vector<8x32xf32> to vector<8xf32>
    %44 = vector.shape_cast %43 : vector<8xf32> to vector<8x1xf32>
    %cst_24 = arith.constant 3.200000e+01 : f32
    %45 = vector.broadcast %cst_24 : f32 to vector<8x1xf32>
    %46 = arith.divf %44, %45 : vector<8x1xf32>
    %47 = arith.mulf %42, %42 : vector<8x32xf32>
    %cst_25 = arith.constant dense<0.000000e+00> : vector<8xf32>
    %48 = vector.multi_reduction <add>, %47, %cst_25 [1] : vector<8x32xf32> to vector<8xf32>
    %49 = vector.shape_cast %48 : vector<8xf32> to vector<8x1xf32>
    %cst_26 = arith.constant 3.200000e+01 : f32
    %50 = vector.broadcast %cst_26 : f32 to vector<8x1xf32>
    %51 = arith.divf %49, %50 : vector<8x1xf32>
    %52 = arith.mulf %46, %46 : vector<8x1xf32>
    %53 = arith.subf %51, %52 : vector<8x1xf32>
    %cst_27 = arith.constant 0.000000e+00 : f32
    %54 = vector.broadcast %cst_27 : f32 to vector<8x1xf32>
    %55 = arith.maximumf %53, %54 : vector<8x1xf32>
    %56 = vector.broadcast %46 : vector<8x1xf32> to vector<8x32xf32>
    %57 = arith.subf %42, %56 : vector<8x32xf32>
    %cst_28 = arith.constant 9.99999974E-6 : f32
    %58 = vector.broadcast %cst_28 : f32 to vector<8x1xf32>
    %59 = arith.addf %55, %58 : vector<8x1xf32>
    %60 = math.rsqrt %59 : vector<8x1xf32>
    %61 = vector.broadcast %60 : vector<8x1xf32> to vector<8x32xf32>
    %62 = arith.mulf %57, %61 : vector<8x32xf32>
    %c1_29 = arith.constant 1 : index
    %c1_30 = arith.constant 1 : index
    %c0_31 = arith.constant 0 : index
    %63 = vector.load %arg5[%c1_29, %c1_30, %c0_31] : memref<3x8x32xf32, #tpu.memory_space<vmem>>, vector<1x1x32xf32>
    %64 = vector.shape_cast %63 : vector<1x1x32xf32> to vector<1x32xf32>
    %65 = vector.broadcast %64 : vector<1x32xf32> to vector<8x32xf32>
    %66 = arith.mulf %62, %65 : vector<8x32xf32>
    %c2_32 = arith.constant 2 : index
    %c1_33 = arith.constant 1 : index
    %c0_34 = arith.constant 0 : index
    %67 = vector.load %arg5[%c2_32, %c1_33, %c0_34] : memref<3x8x32xf32, #tpu.memory_space<vmem>>, vector<1x1x32xf32>
    %68 = vector.shape_cast %67 : vector<1x1x32xf32> to vector<1x32xf32>
    %69 = vector.broadcast %68 : vector<1x32xf32> to vector<8x32xf32>
    %70 = arith.addf %66, %69 : vector<8x32xf32>
    %71 = math.tanh %70 : vector<8x32xf32>
    %c1_35 = arith.constant 1 : index
    %c0_36 = arith.constant 0 : index
    %c0_37 = arith.constant 0 : index
    %72 = vector.load %arg3[%c1_35, %c0_36, %c0_37] : memref<7x32x32xf32, #tpu.memory_space<vmem>>, vector<1x32x32xf32>
    %73 = vector.shape_cast %72 : vector<1x32x32xf32> to vector<32x32xf32>
    %cst_38 = arith.constant dense<0.000000e+00> : vector<8x32xf32>
    %74 = tpu.matmul %71, %73, %cst_38 {dimension_numbers = #tpu.dot_dimension_numbers<[1], [0], [0], [1], [0, 0, 1, 1], [], []>} : vector<8x32xf32>, vector<32x32xf32>, vector<8x32xf32> -> vector<8x32xf32>
    %c0_39 = arith.constant 0 : index
    %c2_40 = arith.constant 2 : index
    %c0_41 = arith.constant 0 : index
    %75 = vector.load %arg5[%c0_39, %c2_40, %c0_41] : memref<3x8x32xf32, #tpu.memory_space<vmem>>, vector<1x1x32xf32>
    %76 = vector.shape_cast %75 : vector<1x1x32xf32> to vector<1x32xf32>
    %77 = vector.broadcast %76 : vector<1x32xf32> to vector<8x32xf32>
    %78 = arith.addf %74, %77 : vector<8x32xf32>
    %cst_42 = arith.constant dense<0.000000e+00> : vector<8xf32>
    %79 = vector.multi_reduction <add>, %78, %cst_42 [1] : vector<8x32xf32> to vector<8xf32>
    %80 = vector.shape_cast %79 : vector<8xf32> to vector<8x1xf32>
    %cst_43 = arith.constant 3.200000e+01 : f32
    %81 = vector.broadcast %cst_43 : f32 to vector<8x1xf32>
    %82 = arith.divf %80, %81 : vector<8x1xf32>
    %83 = arith.mulf %78, %78 : vector<8x32xf32>
    %cst_44 = arith.constant dense<0.000000e+00> : vector<8xf32>
    %84 = vector.multi_reduction <add>, %83, %cst_44 [1] : vector<8x32xf32> to vector<8xf32>
    %85 = vector.shape_cast %84 : vector<8xf32> to vector<8x1xf32>
    %cst_45 = arith.constant 3.200000e+01 : f32
    %86 = vector.broadcast %cst_45 : f32 to vector<8x1xf32>
    %87 = arith.divf %85, %86 : vector<8x1xf32>
    %88 = arith.mulf %82, %82 : vector<8x1xf32>
    %89 = arith.subf %87, %88 : vector<8x1xf32>
    %cst_46 = arith.constant 0.000000e+00 : f32
    %90 = vector.broadcast %cst_46 : f32 to vector<8x1xf32>
    %91 = arith.maximumf %89, %90 : vector<8x1xf32>
    %92 = vector.broadcast %82 : vector<8x1xf32> to vector<8x32xf32>
    %93 = arith.subf %78, %92 : vector<8x32xf32>
    %cst_47 = arith.constant 9.99999974E-6 : f32
    %94 = vector.broadcast %cst_47 : f32 to vector<8x1xf32>
    %95 = arith.addf %91, %94 : vector<8x1xf32>
    %96 = math.rsqrt %95 : vector<8x1xf32>
    %97 = vector.broadcast %96 : vector<8x1xf32> to vector<8x32xf32>
    %98 = arith.mulf %93, %97 : vector<8x32xf32>
    %c1_48 = arith.constant 1 : index
    %c2_49 = arith.constant 2 : index
    %c0_50 = arith.constant 0 : index
    %99 = vector.load %arg5[%c1_48, %c2_49, %c0_50] : memref<3x8x32xf32, #tpu.memory_space<vmem>>, vector<1x1x32xf32>
    %100 = vector.shape_cast %99 : vector<1x1x32xf32> to vector<1x32xf32>
    %101 = vector.broadcast %100 : vector<1x32xf32> to vector<8x32xf32>
    %102 = arith.mulf %98, %101 : vector<8x32xf32>
    %c2_51 = arith.constant 2 : index
    %c2_52 = arith.constant 2 : index
    %c0_53 = arith.constant 0 : index
    %103 = vector.load %arg5[%c2_51, %c2_52, %c0_53] : memref<3x8x32xf32, #tpu.memory_space<vmem>>, vector<1x1x32xf32>
    %104 = vector.shape_cast %103 : vector<1x1x32xf32> to vector<1x32xf32>
    %105 = vector.broadcast %104 : vector<1x32xf32> to vector<8x32xf32>
    %106 = arith.addf %102, %105 : vector<8x32xf32>
    %107 = math.tanh %106 : vector<8x32xf32>
    %c2_54 = arith.constant 2 : index
    %c0_55 = arith.constant 0 : index
    %c0_56 = arith.constant 0 : index
    %108 = vector.load %arg3[%c2_54, %c0_55, %c0_56] : memref<7x32x32xf32, #tpu.memory_space<vmem>>, vector<1x32x32xf32>
    %109 = vector.shape_cast %108 : vector<1x32x32xf32> to vector<32x32xf32>
    %cst_57 = arith.constant dense<0.000000e+00> : vector<8x32xf32>
    %110 = tpu.matmul %107, %109, %cst_57 {dimension_numbers = #tpu.dot_dimension_numbers<[1], [0], [0], [1], [0, 0, 1, 1], [], []>} : vector<8x32xf32>, vector<32x32xf32>, vector<8x32xf32> -> vector<8x32xf32>
    %c0_58 = arith.constant 0 : index
    %c3 = arith.constant 3 : index
    %c0_59 = arith.constant 0 : index
    %111 = vector.load %arg5[%c0_58, %c3, %c0_59] : memref<3x8x32xf32, #tpu.memory_space<vmem>>, vector<1x1x32xf32>
    %112 = vector.shape_cast %111 : vector<1x1x32xf32> to vector<1x32xf32>
    %113 = vector.broadcast %112 : vector<1x32xf32> to vector<8x32xf32>
    %114 = arith.addf %110, %113 : vector<8x32xf32>
    %cst_60 = arith.constant dense<0.000000e+00> : vector<8xf32>
    %115 = vector.multi_reduction <add>, %114, %cst_60 [1] : vector<8x32xf32> to vector<8xf32>
    %116 = vector.shape_cast %115 : vector<8xf32> to vector<8x1xf32>
    %cst_61 = arith.constant 3.200000e+01 : f32
    %117 = vector.broadcast %cst_61 : f32 to vector<8x1xf32>
    %118 = arith.divf %116, %117 : vector<8x1xf32>
    %119 = arith.mulf %114, %114 : vector<8x32xf32>
    %cst_62 = arith.constant dense<0.000000e+00> : vector<8xf32>
    %120 = vector.multi_reduction <add>, %119, %cst_62 [1] : vector<8x32xf32> to vector<8xf32>
    %121 = vector.shape_cast %120 : vector<8xf32> to vector<8x1xf32>
    %cst_63 = arith.constant 3.200000e+01 : f32
    %122 = vector.broadcast %cst_63 : f32 to vector<8x1xf32>
    %123 = arith.divf %121, %122 : vector<8x1xf32>
    %124 = arith.mulf %118, %118 : vector<8x1xf32>
    %125 = arith.subf %123, %124 : vector<8x1xf32>
    %cst_64 = arith.constant 0.000000e+00 : f32
    %126 = vector.broadcast %cst_64 : f32 to vector<8x1xf32>
    %127 = arith.maximumf %125, %126 : vector<8x1xf32>
    %128 = vector.broadcast %118 : vector<8x1xf32> to vector<8x32xf32>
    %129 = arith.subf %114, %128 : vector<8x32xf32>
    %cst_65 = arith.constant 9.99999974E-6 : f32
    %130 = vector.broadcast %cst_65 : f32 to vector<8x1xf32>
    %131 = arith.addf %127, %130 : vector<8x1xf32>
    %132 = math.rsqrt %131 : vector<8x1xf32>
    %133 = vector.broadcast %132 : vector<8x1xf32> to vector<8x32xf32>
    %134 = arith.mulf %129, %133 : vector<8x32xf32>
    %c1_66 = arith.constant 1 : index
    %c3_67 = arith.constant 3 : index
    %c0_68 = arith.constant 0 : index
    %135 = vector.load %arg5[%c1_66, %c3_67, %c0_68] : memref<3x8x32xf32, #tpu.memory_space<vmem>>, vector<1x1x32xf32>
    %136 = vector.shape_cast %135 : vector<1x1x32xf32> to vector<1x32xf32>
    %137 = vector.broadcast %136 : vector<1x32xf32> to vector<8x32xf32>
    %138 = arith.mulf %134, %137 : vector<8x32xf32>
    %c2_69 = arith.constant 2 : index
    %c3_70 = arith.constant 3 : index
    %c0_71 = arith.constant 0 : index
    %139 = vector.load %arg5[%c2_69, %c3_70, %c0_71] : memref<3x8x32xf32, #tpu.memory_space<vmem>>, vector<1x1x32xf32>
    %140 = vector.shape_cast %139 : vector<1x1x32xf32> to vector<1x32xf32>
    %141 = vector.broadcast %140 : vector<1x32xf32> to vector<8x32xf32>
    %142 = arith.addf %138, %141 : vector<8x32xf32>
    %143 = math.tanh %142 : vector<8x32xf32>
    %c3_72 = arith.constant 3 : index
    %c0_73 = arith.constant 0 : index
    %c0_74 = arith.constant 0 : index
    %144 = vector.load %arg3[%c3_72, %c0_73, %c0_74] : memref<7x32x32xf32, #tpu.memory_space<vmem>>, vector<1x32x32xf32>
    %145 = vector.shape_cast %144 : vector<1x32x32xf32> to vector<32x32xf32>
    %cst_75 = arith.constant dense<0.000000e+00> : vector<8x32xf32>
    %146 = tpu.matmul %143, %145, %cst_75 {dimension_numbers = #tpu.dot_dimension_numbers<[1], [0], [0], [1], [0, 0, 1, 1], [], []>} : vector<8x32xf32>, vector<32x32xf32>, vector<8x32xf32> -> vector<8x32xf32>
    %c0_76 = arith.constant 0 : index
    %c4 = arith.constant 4 : index
    %c0_77 = arith.constant 0 : index
    %147 = vector.load %arg5[%c0_76, %c4, %c0_77] : memref<3x8x32xf32, #tpu.memory_space<vmem>>, vector<1x1x32xf32>
    %148 = vector.shape_cast %147 : vector<1x1x32xf32> to vector<1x32xf32>
    %149 = vector.broadcast %148 : vector<1x32xf32> to vector<8x32xf32>
    %150 = arith.addf %146, %149 : vector<8x32xf32>
    %cst_78 = arith.constant dense<0.000000e+00> : vector<8xf32>
    %151 = vector.multi_reduction <add>, %150, %cst_78 [1] : vector<8x32xf32> to vector<8xf32>
    %152 = vector.shape_cast %151 : vector<8xf32> to vector<8x1xf32>
    %cst_79 = arith.constant 3.200000e+01 : f32
    %153 = vector.broadcast %cst_79 : f32 to vector<8x1xf32>
    %154 = arith.divf %152, %153 : vector<8x1xf32>
    %155 = arith.mulf %150, %150 : vector<8x32xf32>
    %cst_80 = arith.constant dense<0.000000e+00> : vector<8xf32>
    %156 = vector.multi_reduction <add>, %155, %cst_80 [1] : vector<8x32xf32> to vector<8xf32>
    %157 = vector.shape_cast %156 : vector<8xf32> to vector<8x1xf32>
    %cst_81 = arith.constant 3.200000e+01 : f32
    %158 = vector.broadcast %cst_81 : f32 to vector<8x1xf32>
    %159 = arith.divf %157, %158 : vector<8x1xf32>
    %160 = arith.mulf %154, %154 : vector<8x1xf32>
    %161 = arith.subf %159, %160 : vector<8x1xf32>
    %cst_82 = arith.constant 0.000000e+00 : f32
    %162 = vector.broadcast %cst_82 : f32 to vector<8x1xf32>
    %163 = arith.maximumf %161, %162 : vector<8x1xf32>
    %164 = vector.broadcast %154 : vector<8x1xf32> to vector<8x32xf32>
    %165 = arith.subf %150, %164 : vector<8x32xf32>
    %cst_83 = arith.constant 9.99999974E-6 : f32
    %166 = vector.broadcast %cst_83 : f32 to vector<8x1xf32>
    %167 = arith.addf %163, %166 : vector<8x1xf32>
    %168 = math.rsqrt %167 : vector<8x1xf32>
    %169 = vector.broadcast %168 : vector<8x1xf32> to vector<8x32xf32>
    %170 = arith.mulf %165, %169 : vector<8x32xf32>
    %c1_84 = arith.constant 1 : index
    %c4_85 = arith.constant 4 : index
    %c0_86 = arith.constant 0 : index
    %171 = vector.load %arg5[%c1_84, %c4_85, %c0_86] : memref<3x8x32xf32, #tpu.memory_space<vmem>>, vector<1x1x32xf32>
    %172 = vector.shape_cast %171 : vector<1x1x32xf32> to vector<1x32xf32>
    %173 = vector.broadcast %172 : vector<1x32xf32> to vector<8x32xf32>
    %174 = arith.mulf %170, %173 : vector<8x32xf32>
    %c2_87 = arith.constant 2 : index
    %c4_88 = arith.constant 4 : index
    %c0_89 = arith.constant 0 : index
    %175 = vector.load %arg5[%c2_87, %c4_88, %c0_89] : memref<3x8x32xf32, #tpu.memory_space<vmem>>, vector<1x1x32xf32>
    %176 = vector.shape_cast %175 : vector<1x1x32xf32> to vector<1x32xf32>
    %177 = vector.broadcast %176 : vector<1x32xf32> to vector<8x32xf32>
    %178 = arith.addf %174, %177 : vector<8x32xf32>
    %179 = math.tanh %178 : vector<8x32xf32>
    %c4_90 = arith.constant 4 : index
    %c0_91 = arith.constant 0 : index
    %c0_92 = arith.constant 0 : index
    %180 = vector.load %arg3[%c4_90, %c0_91, %c0_92] : memref<7x32x32xf32, #tpu.memory_space<vmem>>, vector<1x32x32xf32>
    %181 = vector.shape_cast %180 : vector<1x32x32xf32> to vector<32x32xf32>
    %cst_93 = arith.constant dense<0.000000e+00> : vector<8x32xf32>
    %182 = tpu.matmul %179, %181, %cst_93 {dimension_numbers = #tpu.dot_dimension_numbers<[1], [0], [0], [1], [0, 0, 1, 1], [], []>} : vector<8x32xf32>, vector<32x32xf32>, vector<8x32xf32> -> vector<8x32xf32>
    %c0_94 = arith.constant 0 : index
    %c5 = arith.constant 5 : index
    %c0_95 = arith.constant 0 : index
    %183 = vector.load %arg5[%c0_94, %c5, %c0_95] : memref<3x8x32xf32, #tpu.memory_space<vmem>>, vector<1x1x32xf32>
    %184 = vector.shape_cast %183 : vector<1x1x32xf32> to vector<1x32xf32>
    %185 = vector.broadcast %184 : vector<1x32xf32> to vector<8x32xf32>
    %186 = arith.addf %182, %185 : vector<8x32xf32>
    %cst_96 = arith.constant dense<0.000000e+00> : vector<8xf32>
    %187 = vector.multi_reduction <add>, %186, %cst_96 [1] : vector<8x32xf32> to vector<8xf32>
    %188 = vector.shape_cast %187 : vector<8xf32> to vector<8x1xf32>
    %cst_97 = arith.constant 3.200000e+01 : f32
    %189 = vector.broadcast %cst_97 : f32 to vector<8x1xf32>
    %190 = arith.divf %188, %189 : vector<8x1xf32>
    %191 = arith.mulf %186, %186 : vector<8x32xf32>
    %cst_98 = arith.constant dense<0.000000e+00> : vector<8xf32>
    %192 = vector.multi_reduction <add>, %191, %cst_98 [1] : vector<8x32xf32> to vector<8xf32>
    %193 = vector.shape_cast %192 : vector<8xf32> to vector<8x1xf32>
    %cst_99 = arith.constant 3.200000e+01 : f32
    %194 = vector.broadcast %cst_99 : f32 to vector<8x1xf32>
    %195 = arith.divf %193, %194 : vector<8x1xf32>
    %196 = arith.mulf %190, %190 : vector<8x1xf32>
    %197 = arith.subf %195, %196 : vector<8x1xf32>
    %cst_100 = arith.constant 0.000000e+00 : f32
    %198 = vector.broadcast %cst_100 : f32 to vector<8x1xf32>
    %199 = arith.maximumf %197, %198 : vector<8x1xf32>
    %200 = vector.broadcast %190 : vector<8x1xf32> to vector<8x32xf32>
    %201 = arith.subf %186, %200 : vector<8x32xf32>
    %cst_101 = arith.constant 9.99999974E-6 : f32
    %202 = vector.broadcast %cst_101 : f32 to vector<8x1xf32>
    %203 = arith.addf %199, %202 : vector<8x1xf32>
    %204 = math.rsqrt %203 : vector<8x1xf32>
    %205 = vector.broadcast %204 : vector<8x1xf32> to vector<8x32xf32>
    %206 = arith.mulf %201, %205 : vector<8x32xf32>
    %c1_102 = arith.constant 1 : index
    %c5_103 = arith.constant 5 : index
    %c0_104 = arith.constant 0 : index
    %207 = vector.load %arg5[%c1_102, %c5_103, %c0_104] : memref<3x8x32xf32, #tpu.memory_space<vmem>>, vector<1x1x32xf32>
    %208 = vector.shape_cast %207 : vector<1x1x32xf32> to vector<1x32xf32>
    %209 = vector.broadcast %208 : vector<1x32xf32> to vector<8x32xf32>
    %210 = arith.mulf %206, %209 : vector<8x32xf32>
    %c2_105 = arith.constant 2 : index
    %c5_106 = arith.constant 5 : index
    %c0_107 = arith.constant 0 : index
    %211 = vector.load %arg5[%c2_105, %c5_106, %c0_107] : memref<3x8x32xf32, #tpu.memory_space<vmem>>, vector<1x1x32xf32>
    %212 = vector.shape_cast %211 : vector<1x1x32xf32> to vector<1x32xf32>
    %213 = vector.broadcast %212 : vector<1x32xf32> to vector<8x32xf32>
    %214 = arith.addf %210, %213 : vector<8x32xf32>
    %215 = math.tanh %214 : vector<8x32xf32>
    %c5_108 = arith.constant 5 : index
    %c0_109 = arith.constant 0 : index
    %c0_110 = arith.constant 0 : index
    %216 = vector.load %arg3[%c5_108, %c0_109, %c0_110] : memref<7x32x32xf32, #tpu.memory_space<vmem>>, vector<1x32x32xf32>
    %217 = vector.shape_cast %216 : vector<1x32x32xf32> to vector<32x32xf32>
    %cst_111 = arith.constant dense<0.000000e+00> : vector<8x32xf32>
    %218 = tpu.matmul %215, %217, %cst_111 {dimension_numbers = #tpu.dot_dimension_numbers<[1], [0], [0], [1], [0, 0, 1, 1], [], []>} : vector<8x32xf32>, vector<32x32xf32>, vector<8x32xf32> -> vector<8x32xf32>
    %c0_112 = arith.constant 0 : index
    %c6 = arith.constant 6 : index
    %c0_113 = arith.constant 0 : index
    %219 = vector.load %arg5[%c0_112, %c6, %c0_113] : memref<3x8x32xf32, #tpu.memory_space<vmem>>, vector<1x1x32xf32>
    %220 = vector.shape_cast %219 : vector<1x1x32xf32> to vector<1x32xf32>
    %221 = vector.broadcast %220 : vector<1x32xf32> to vector<8x32xf32>
    %222 = arith.addf %218, %221 : vector<8x32xf32>
    %cst_114 = arith.constant dense<0.000000e+00> : vector<8xf32>
    %223 = vector.multi_reduction <add>, %222, %cst_114 [1] : vector<8x32xf32> to vector<8xf32>
    %224 = vector.shape_cast %223 : vector<8xf32> to vector<8x1xf32>
    %cst_115 = arith.constant 3.200000e+01 : f32
    %225 = vector.broadcast %cst_115 : f32 to vector<8x1xf32>
    %226 = arith.divf %224, %225 : vector<8x1xf32>
    %227 = arith.mulf %222, %222 : vector<8x32xf32>
    %cst_116 = arith.constant dense<0.000000e+00> : vector<8xf32>
    %228 = vector.multi_reduction <add>, %227, %cst_116 [1] : vector<8x32xf32> to vector<8xf32>
    %229 = vector.shape_cast %228 : vector<8xf32> to vector<8x1xf32>
    %cst_117 = arith.constant 3.200000e+01 : f32
    %230 = vector.broadcast %cst_117 : f32 to vector<8x1xf32>
    %231 = arith.divf %229, %230 : vector<8x1xf32>
    %232 = arith.mulf %226, %226 : vector<8x1xf32>
    %233 = arith.subf %231, %232 : vector<8x1xf32>
    %cst_118 = arith.constant 0.000000e+00 : f32
    %234 = vector.broadcast %cst_118 : f32 to vector<8x1xf32>
    %235 = arith.maximumf %233, %234 : vector<8x1xf32>
    %236 = vector.broadcast %226 : vector<8x1xf32> to vector<8x32xf32>
    %237 = arith.subf %222, %236 : vector<8x32xf32>
    %cst_119 = arith.constant 9.99999974E-6 : f32
    %238 = vector.broadcast %cst_119 : f32 to vector<8x1xf32>
    %239 = arith.addf %235, %238 : vector<8x1xf32>
    %240 = math.rsqrt %239 : vector<8x1xf32>
    %241 = vector.broadcast %240 : vector<8x1xf32> to vector<8x32xf32>
    %242 = arith.mulf %237, %241 : vector<8x32xf32>
    %c1_120 = arith.constant 1 : index
    %c6_121 = arith.constant 6 : index
    %c0_122 = arith.constant 0 : index
    %243 = vector.load %arg5[%c1_120, %c6_121, %c0_122] : memref<3x8x32xf32, #tpu.memory_space<vmem>>, vector<1x1x32xf32>
    %244 = vector.shape_cast %243 : vector<1x1x32xf32> to vector<1x32xf32>
    %245 = vector.broadcast %244 : vector<1x32xf32> to vector<8x32xf32>
    %246 = arith.mulf %242, %245 : vector<8x32xf32>
    %c2_123 = arith.constant 2 : index
    %c6_124 = arith.constant 6 : index
    %c0_125 = arith.constant 0 : index
    %247 = vector.load %arg5[%c2_123, %c6_124, %c0_125] : memref<3x8x32xf32, #tpu.memory_space<vmem>>, vector<1x1x32xf32>
    %248 = vector.shape_cast %247 : vector<1x1x32xf32> to vector<1x32xf32>
    %249 = vector.broadcast %248 : vector<1x32xf32> to vector<8x32xf32>
    %250 = arith.addf %246, %249 : vector<8x32xf32>
    %251 = math.tanh %250 : vector<8x32xf32>
    %c6_126 = arith.constant 6 : index
    %c0_127 = arith.constant 0 : index
    %c0_128 = arith.constant 0 : index
    %252 = vector.load %arg3[%c6_126, %c0_127, %c0_128] : memref<7x32x32xf32, #tpu.memory_space<vmem>>, vector<1x32x32xf32>
    %253 = vector.shape_cast %252 : vector<1x32x32xf32> to vector<32x32xf32>
    %cst_129 = arith.constant dense<0.000000e+00> : vector<8x32xf32>
    %254 = tpu.matmul %251, %253, %cst_129 {dimension_numbers = #tpu.dot_dimension_numbers<[1], [0], [0], [1], [0, 0, 1, 1], [], []>} : vector<8x32xf32>, vector<32x32xf32>, vector<8x32xf32> -> vector<8x32xf32>
    %c0_130 = arith.constant 0 : index
    %c7 = arith.constant 7 : index
    %c0_131 = arith.constant 0 : index
    %255 = vector.load %arg5[%c0_130, %c7, %c0_131] : memref<3x8x32xf32, #tpu.memory_space<vmem>>, vector<1x1x32xf32>
    %256 = vector.shape_cast %255 : vector<1x1x32xf32> to vector<1x32xf32>
    %257 = vector.broadcast %256 : vector<1x32xf32> to vector<8x32xf32>
    %258 = arith.addf %254, %257 : vector<8x32xf32>
    %cst_132 = arith.constant dense<0.000000e+00> : vector<8xf32>
    %259 = vector.multi_reduction <add>, %258, %cst_132 [1] : vector<8x32xf32> to vector<8xf32>
    %260 = vector.shape_cast %259 : vector<8xf32> to vector<8x1xf32>
    %cst_133 = arith.constant 3.200000e+01 : f32
    %261 = vector.broadcast %cst_133 : f32 to vector<8x1xf32>
    %262 = arith.divf %260, %261 : vector<8x1xf32>
    %263 = arith.mulf %258, %258 : vector<8x32xf32>
    %cst_134 = arith.constant dense<0.000000e+00> : vector<8xf32>
    %264 = vector.multi_reduction <add>, %263, %cst_134 [1] : vector<8x32xf32> to vector<8xf32>
    %265 = vector.shape_cast %264 : vector<8xf32> to vector<8x1xf32>
    %cst_135 = arith.constant 3.200000e+01 : f32
    %266 = vector.broadcast %cst_135 : f32 to vector<8x1xf32>
    %267 = arith.divf %265, %266 : vector<8x1xf32>
    %268 = arith.mulf %262, %262 : vector<8x1xf32>
    %269 = arith.subf %267, %268 : vector<8x1xf32>
    %cst_136 = arith.constant 0.000000e+00 : f32
    %270 = vector.broadcast %cst_136 : f32 to vector<8x1xf32>
    %271 = arith.maximumf %269, %270 : vector<8x1xf32>
    %272 = vector.broadcast %262 : vector<8x1xf32> to vector<8x32xf32>
    %273 = arith.subf %258, %272 : vector<8x32xf32>
    %cst_137 = arith.constant 9.99999974E-6 : f32
    %274 = vector.broadcast %cst_137 : f32 to vector<8x1xf32>
    %275 = arith.addf %271, %274 : vector<8x1xf32>
    %276 = math.rsqrt %275 : vector<8x1xf32>
    %277 = vector.broadcast %276 : vector<8x1xf32> to vector<8x32xf32>
    %278 = arith.mulf %273, %277 : vector<8x32xf32>
    %c1_138 = arith.constant 1 : index
    %c7_139 = arith.constant 7 : index
    %c0_140 = arith.constant 0 : index
    %279 = vector.load %arg5[%c1_138, %c7_139, %c0_140] : memref<3x8x32xf32, #tpu.memory_space<vmem>>, vector<1x1x32xf32>
    %280 = vector.shape_cast %279 : vector<1x1x32xf32> to vector<1x32xf32>
    %281 = vector.broadcast %280 : vector<1x32xf32> to vector<8x32xf32>
    %282 = arith.mulf %278, %281 : vector<8x32xf32>
    %c2_141 = arith.constant 2 : index
    %c7_142 = arith.constant 7 : index
    %c0_143 = arith.constant 0 : index
    %283 = vector.load %arg5[%c2_141, %c7_142, %c0_143] : memref<3x8x32xf32, #tpu.memory_space<vmem>>, vector<1x1x32xf32>
    %284 = vector.shape_cast %283 : vector<1x1x32xf32> to vector<1x32xf32>
    %285 = vector.broadcast %284 : vector<1x32xf32> to vector<8x32xf32>
    %286 = arith.addf %282, %285 : vector<8x32xf32>
    %287 = math.tanh %286 : vector<8x32xf32>
    %c0_144 = arith.constant 0 : index
    %c0_145 = arith.constant 0 : index
    %288 = vector.load %arg4[%c0_144, %c0_145] : memref<40x128xf32, #tpu.memory_space<vmem>>, vector<32x128xf32>
    %c32 = arith.constant 32 : index
    %c0_146 = arith.constant 0 : index
    %289 = vector.load %arg4[%c32, %c0_146] : memref<40x128xf32, #tpu.memory_space<vmem>>, vector<1x128xf32>
    %cst_147 = arith.constant dense<0.000000e+00> : vector<8x128xf32>
    %290 = tpu.matmul %287, %288, %cst_147 {dimension_numbers = #tpu.dot_dimension_numbers<[1], [0], [0], [1], [0, 0, 1, 1], [], []>} : vector<8x32xf32>, vector<32x128xf32>, vector<8x128xf32> -> vector<8x128xf32>
    %291 = vector.broadcast %289 : vector<1x128xf32> to vector<8x128xf32>
    %292 = arith.addf %290, %291 : vector<8x128xf32>
    %c0_148 = arith.constant 0 : index
    %c0_149 = arith.constant 0 : index
    %293 = vector.load %arg6[%c0_148, %c0_149] : memref<8x128xf32, #tpu.memory_space<vmem>>, vector<8x128xf32>
    tpu.vector_store %arg6[%c0_148, %c0_149], %292 {strides = array<i32>} : memref<8x128xf32, #tpu.memory_space<vmem>>, vector<8x128xf32>,
    return
  }
  func.func @transform_0(%arg0: i32) -> (i32, i32) {
    %c0_i32 = arith.constant 0 : i32
    %c0_i32_0 = arith.constant 0 : i32
    return %arg0, %c0_i32 : i32, i32
  }
  func.func @transform_1(%arg0: i32) -> (i32, i32) {
    %c0_i32 = arith.constant 0 : i32
    %c0_i32_0 = arith.constant 0 : i32
    %c0_i32_1 = arith.constant 0 : i32
    return %c0_i32, %c0_i32_0 : i32, i32
  }
  func.func @transform_2(%arg0: i32) -> (i32, i32, i32) {
    %c0_i32 = arith.constant 0 : i32
    %c0_i32_0 = arith.constant 0 : i32
    %c0_i32_1 = arith.constant 0 : i32
    %c0_i32_2 = arith.constant 0 : i32
    return %c0_i32, %c0_i32_0, %c0_i32_1 : i32, i32, i32
  }
  func.func @transform_3(%arg0: i32) -> (i32, i32) {
    %c0_i32 = arith.constant 0 : i32
    %c0_i32_0 = arith.constant 0 : i32
    %c0_i32_1 = arith.constant 0 : i32
    return %c0_i32, %c0_i32_0 : i32, i32
  }
  func.func @transform_4(%arg0: i32) -> (i32, i32, i32) {
    %c0_i32 = arith.constant 0 : i32
    %c0_i32_0 = arith.constant 0 : i32
    %c0_i32_1 = arith.constant 0 : i32
    %c0_i32_2 = arith.constant 0 : i32
    return %c0_i32, %c0_i32_0, %c0_i32_1 : i32, i32, i32
  }
  func.func @transform_5(%arg0: i32) -> (i32, i32) {
    %c0_i32 = arith.constant 0 : i32
    %c0_i32_0 = arith.constant 0 : i32
    return %arg0, %c0_i32 : i32, i32
  }
}

</mosaic_0001>

<bundles_post_ra>
// kernel: tpu_custom_call.1
= control target key start
LH: loop header
LB: loop body
LE: loop exit
PB: predicated region body
PF: predicated region fallthrough
CT: control target
= control target key end

     0   :  { %10 = vsyncpa [#allocation3], 0  ;;  %s1675_s0 = inlined_call_operand.hbm [shape: f32[8,16], index: 0, kind: input, shape index: {}]   ;;  %s1676_s1 = inlined_call_operand.hbm [shape: f32[16,32], index: 1, kind: input, shape index: {}]   ;;  %s1677_s2 = inlined_call_operand.hbm [shape: f32[7,32,32], index: 2, kind: input, shape index: {}]   ;;  %s1678_s3 = inlined_call_operand.hbm [shape: f32[40,128], index: 3, kind: input, shape index: {}]   ;;  %s1679_s4 = inlined_call_operand.hbm [shape: f32[3,8,32], index: 4, kind: input, shape index: {}]   ;;  %s1680_s5 = inlined_call_operand.hbm [shape: f32[8,128], index: 5, kind: output, shape index: {}]  }
   0x1   :  { %11 = vsyncpa [#allocation6], 0 }
   0x2   :  { %12 = vsyncpa [#allocation9], 0 }
   0x3   :  { %13 = vsyncpa [#allocation4], 0  ;;  %s1491_s18 = smov [#allocation5]   ;;  %s1351_s22 = scalar_lea.hbm %s1676_s1, 256 }
   0x4   :  { %s29_s19 = sshll.u32 %s1491_s18, 4  ;;  %p1352_p0 = scmp.ne.s32.totalorder %s1676_s1, %s1351_s22  ;;  %s30_s19 = int_to_ptr.vmem [resolvable:$true] %s29_s19 }
   0x5   :  { %p1355_p1 = scmp.lt.u32.totalorder %s1351_s22, %s1676_s1 }
   0x7   :  { %p1357_p2 = pnand %p1355_p1, %p1352_p0 }
   0x9   :  { %1360 = shalt.err (!%p1357_p2)
}
   0xa   :  { %s1361_s27 = scalar_lea.vmem %s30_s19, 256  ;;  %p1366_p4 = scmp.lt.s32.totalorder %s30_s19, %s30_s19 }
   0xb   :  { %p1362_p3 = scmp.ne.s32.totalorder %s30_s19, %s1361_s27  ;;  %p1367_p5 = scmp.lt.s32.totalorder %s1361_s27, %s1361_s27 }
   0xd   :  { %p1368_p6 = por %p1367_p5, %p1366_p4 }
   0xf   :  { %p1369_p7 = pnand %p1368_p6, %p1362_p3 }
  0x11   :  { %1372 = shalt.err (!%p1369_p7)
}
  0x12   :  { %s1492_s28 = smov 128   ;;  %s1493_s29 = smov 8  }
  0x13   :  { %35 = dma.hbm_to_vmem [thread:$0]  %s1676_s1, 256, %s30_s19, [#allocation6], %s1492_s28, %s1492_s28, %s1493_s29  }
  0x14   :  { %s1494_s7 = smov [#allocation8]   ;;  %s1495_s9 = smov [#allocation2]  }
  0x15   :  { %s53_s8 = sshll.u32 %s1494_s7, 4  ;;  %s20_s10 = sshll.u32 %s1495_s9, 4  ;;  %s54_s8 = int_to_ptr.vmem [resolvable:$true] %s53_s8  ;;  %s21_s10 = int_to_ptr.vmem [resolvable:$true] %s20_s10 }
  0x16   :  { %s1373_s13 = scalar_lea.hbm %s1678_s3, 640 }
  0x17   :  { %p1374_p8 = scmp.ne.s32.totalorder %s1678_s3, %s1373_s13  ;;  %p1377_p9 = scmp.lt.u32.totalorder %s1373_s13, %s1678_s3 }
  0x19   :  { %p1379_p10 = pnand %p1377_p9, %p1374_p8 }
  0x1b   :  { %1382 = shalt.err (!%p1379_p10)
}
  0x1c   :  { %s1383_s1 = scalar_lea.vmem %s54_s8, 640  ;;  %p1388_p12 = scmp.lt.s32.totalorder %s54_s8, %s54_s8 }
  0x1d   :  { %p1384_p11 = scmp.ne.s32.totalorder %s54_s8, %s1383_s1  ;;  %p1389_p13 = scmp.lt.s32.totalorder %s1383_s1, %s1383_s1 }
  0x1f   :  { %p1390_p0 = por %p1389_p13, %p1388_p12 }
  0x21   :  { %p1391_p1 = pnand %p1390_p0, %p1384_p11 }
  0x23   :  { %1394 = shalt.err (!%p1391_p1)
}
  0x24   :  { %59 = dma.hbm_to_vmem [thread:$0]  %s1678_s3, 640, %s54_s8, [#allocation9], %s1492_s28, %s1492_s28, %s1493_s29  }
  0x25   :  { %s1395_s22 = scalar_lea.hbm %s1675_s0, 128 }
  0x26   :  { %p1396_p2 = scmp.ne.s32.totalorder %s1675_s0, %s1395_s22  ;;  %p1399_p3 = scmp.lt.u32.totalorder %s1395_s22, %s1675_s0 }
  0x28   :  { %p1401_p4 = pnand %p1399_p3, %p1396_p2 }
  0x2a   :  { %1404 = shalt.err (!%p1401_p4)
}
  0x2b   :  { %s1405_s27 = scalar_lea.vmem %s21_s10, 128  ;;  %p1410_p6 = scmp.lt.s32.totalorder %s21_s10, %s21_s10 }
  0x2c   :  { %p1406_p5 = scmp.ne.s32.totalorder %s21_s10, %s1405_s27  ;;  %p1411_p7 = scmp.lt.s32.totalorder %s1405_s27, %s1405_s27 }
  0x2e   :  { %p1412_p8 = por %p1411_p7, %p1410_p6 }
  0x30   :  { %p1413_p9 = pnand %p1412_p8, %p1406_p5 }
  0x32   :  { %1416 = shalt.err (!%p1413_p9)
}
  0x33   :  { %23 = dma.hbm_to_vmem [thread:$0]  %s1675_s0, 128, %s21_s10, [#allocation3]  }
  0x34   :  { %s1496_s6 = smov [#allocation7]   ;;  %s1497_s8 = smov [#allocation10]  }
  0x35   :  { %s41_s7 = sshll.u32 %s1496_s6, 4  ;;  %s65_s9 = sshll.u32 %s1497_s8, 4  ;;  %s42_s7 = int_to_ptr.vmem [resolvable:$true] %s41_s7  ;;  %s66_s9 = int_to_ptr.vmem [resolvable:$true] %s65_s9 }
  0x36   :  { %s1417_s13 = scalar_lea.hbm %s1677_s2, 3584 }
  0x37   :  { %p1418_p10 = scmp.ne.s32.totalorder %s1677_s2, %s1417_s13  ;;  %p1421_p11 = scmp.lt.u32.totalorder %s1417_s13, %s1677_s2 }
  0x39   :  { %p1423_p12 = pnand %p1421_p11, %p1418_p10 }
  0x3b   :  { %1426 = shalt.err (!%p1423_p12)
}
  0x3c   :  { %s1427_s0 = scalar_lea.vmem %s42_s7, 3584  ;;  %p1432_p0 = scmp.lt.s32.totalorder %s42_s7, %s42_s7 }
  0x3d   :  { %p1428_p13 = scmp.ne.s32.totalorder %s42_s7, %s1427_s0  ;;  %p1433_p1 = scmp.lt.s32.totalorder %s1427_s0, %s1427_s0 }
  0x3f   :  { %p1434_p2 = por %p1433_p1, %p1432_p0 }
  0x41   :  { %p1435_p3 = pnand %p1434_p2, %p1428_p13 }
  0x43   :  { %1438 = shalt.err (!%p1435_p3)
}
  0x44   :  { %47 = dma.hbm_to_vmem [thread:$0]  %s1677_s2, 3584, %s42_s7, [#allocation6], %s1492_s28, %s1492_s28, %s1493_s29  }
  0x45   :  { %s1439_s20 = scalar_lea.hbm %s1679_s4, 384 }
  0x46   :  { %p1440_p4 = scmp.ne.s32.totalorder %s1679_s4, %s1439_s20  ;;  %p1443_p5 = scmp.lt.u32.totalorder %s1439_s20, %s1679_s4 }
  0x48   :  { %p1445_p6 = pnand %p1443_p5, %p1440_p4 }
  0x4a   :  { %1448 = shalt.err (!%p1445_p6)
}
  0x4b   :  { %s1449_s25 = scalar_lea.vmem %s66_s9, 384  ;;  %p1454_p8 = scmp.lt.s32.totalorder %s66_s9, %s66_s9 }
  0x4c   :  { %p1450_p7 = scmp.ne.s32.totalorder %s66_s9, %s1449_s25  ;;  %p1455_p9 = scmp.lt.s32.totalorder %s1449_s25, %s1449_s25 }
  0x4e   :  { %p1456_p10 = por %p1455_p9, %p1454_p8 }
  0x50   :  { %p1457_p11 = pnand %p1456_p10, %p1450_p7 }
  0x52   :  { %1460 = shalt.err (!%p1457_p11)
}
  0x53   :  { %71 = dma.hbm_to_vmem [thread:$0]  %s1679_s4, 384, %s66_s9, [#allocation9], %s1492_s28, %s1492_s28, %s1493_s29  }
  0x54   :  { %1483 = dma.done.wait [#allocation3], 128  }
  0x55   :  { %1484 = vsyncadd [#allocation3], 4294967168 }
  0x56   :  { %1485 = dma.done.wait [#allocation6], 3840  }
  0x57   :  { %1486 = vsyncadd [#allocation6], 4294963456 }
  0x58   :  { %1487 = dma.done.wait [#allocation9], 1024  }
  0x59   :  { %1488 = vsyncadd [#allocation9], 4294966272  ;;  %v1498_v0 = vmov 0.0|0.0   ;;  %vm1499_vm0 = vmmov 0   ;;  %v1500_v1 = vmov 0.0   ;;  %v88_v2 = vld [vmem:[#allocation5] sm:$0xff] }
  0x5a   :  { %1257 = vmatprep.subr.bf16.mxu0 %v1498_v0  ;;  %1166 = vmatprep.mubr.msk.f32.mxu0 %vm1499_vm0, %v1500_v1  ;;  %v89_v3 = vld [vmem:[#allocation5 + $0x8] sm:$0xff]  ;;  %v87_v5 = vld [vmem:[#allocation2] sm:$0xff]  ;;  %vm95_vm1 = vcmask 130048   ;;  %vm169_vm2 = vcmask 261120   ;;  %v202_v13 = vld [vmem:[#allocation7] sm:$0xff]  ;;  %s1501_s4 = smov [#allocation11]  }
  0x5b   :  { %1260 = vmatprep.subr.bf16.mxu1 %v1498_v0  ;;  %1177 = vmatprep.mubr.msk.f32.mxu1 %vm1499_vm0, %v1500_v1  ;;  %v1258_v4 = vpack.c.bf16 %v89_v3, %v88_v2  ;;  %v1085_v6 = vld [vmem:[#allocation10] ss:$0 sm:$0xff]  ;;  %v204_v15 = vld [vmem:[#allocation7 + $0x10] sm:$0xff]  ;;  %v205_v17 = vld [vmem:[#allocation7 + $0x18] sm:$0xff]  ;;  %s1074_s28 = sshll.u32 %s1501_s4, 4  ;;  %s1075_s28 = int_to_ptr.vmem [resolvable:$true] %s1074_s28 }
  0x5c   :  { %v203_v14 = vld [vmem:[#allocation7 + $0x8] sm:$0xff]  ;;  %v1264_v18 = vpack.c.bf16 %v205_v17, %v204_v15  ;;  %v1087_v29 = vld [vmem:[#allocation10 + $0x8] ss:$0 sm:$0xff]  ;;  %v1088_v31 = vld [vmem:[#allocation10 + $0x10] ss:$0 sm:$0xff]  ;;  %s1461_s29 = scalar_lea.vmem %s1075_s28, 128  ;;  %p1466_p13 = scmp.lt.s32.totalorder %s1075_s28, %s1075_s28 }
  0x5d   :  { %1259 = vmatpush3.bf16.msra.mxu0 %v1258_v4  ;;  %v1261_v16 = vpack.c.bf16 %v203_v14, %v202_v13  ;;  %v1089_v35 = vld [vmem:[#allocation10 + $0x1] ss:$0 sm:$0xff]  ;;  %v314_v42 = vld [vmem:[#allocation7 + $0x20] sm:$0xff]  ;;  %v316_v44 = vld [vmem:[#allocation7 + $0x30] sm:$0xff]  ;;  %p1462_p12 = scmp.ne.s32.totalorder %s1075_s28, %s1461_s29  ;;  %p1467_p0 = scmp.lt.s32.totalorder %s1461_s29, %s1461_s29 }
  0x5e   :  { %1266 = vmatprep.subr.bf16.mxu0 %v1498_v0  ;;  %v315_v43 = vld [vmem:[#allocation7 + $0x28] sm:$0xff]  ;;  %v317_v46 = vld [vmem:[#allocation7 + $0x38] sm:$0xff]  ;;  %v1091_v58 = vld [vmem:[#allocation10 + $0x9] ss:$0 sm:$0xff] }
  0x5f   :  { %1262 = vmatpush3.bf16.msra.mxu1 %v1261_v16  ;;  %v1267_v45 = vpack.c.bf16 %v315_v43, %v314_v42  ;;  %v1270_v47 = vpack.c.bf16 %v317_v46, %v316_v44  ;;  %v1092_v60 = vld [vmem:[#allocation10 + $0x11] ss:$0 sm:$0xff]  ;;  %v1093_v2 = vld [vmem:[#allocation10 + $0x2] ss:$0 sm:$0xff]  ;;  %p1468_p1 = por %p1467_p0, %p1466_p13 }
  0x60   :  { %1167 = vmatmul.mubr.msk.f32.vlgmr.msra.gmra.mrb[0].mxu0 %vm95_vm1, %v87_v5  ;;  %1263 = vmatprep.subr.bf16.mxu1 %v1498_v0  ;;  %v429_v13 = vld [vmem:[#allocation7 + $0x58] sm:$0xff] }
  0x61   :  { %1188 = vmatprep.mubr.msk.f32.mxu0 %vm1499_vm0, %v1500_v1  ;;  %1268 = vmatpush3.bf16.msra.mxu0 %v1267_v45  ;;  %v541_v42 = vld [vmem:[#allocation7 + $0x78] sm:$0xff]  ;;  %p1469_p2 = pnand %p1468_p1, %p1462_p12 }
  0x62   :  { %1269 = vmatprep.subr.bf16.mxu0 %v1498_v0 }
  0x63   :  { %1265 = vmatpush3.bf16.msra.mxu1 %v1264_v18 }
  0x64   :  { %1272 = vmatprep.subr.bf16.mxu1 %v1498_v0 }
  0x65   :  { %1271 = vmatpush3.bf16.msra.mxu0 %v1270_v47 }
  0x66   :  { %1278 = vmatprep.subr.bf16.mxu0 %v1498_v0 }
 0x133   :  { %v165_v7 = vpop.f32.mrb[0].mxu0 }
 0x134   :  { %v166_v8 = vadd.f32 %v1085_v6, %v165_v7  ;;  %v1168_v9 = vpop.f32.mrb[1].mxu0 }
 0x135   :  { %v426_v9 = vld [vmem:[#allocation7 + $0x40] sm:$0xff] }
 0x136   :  { %v170_v10 = vsel %vm169_vm2, %v166_v8, 0.0  ;;  %v175_v11 = vmul.f32 %v166_v8, %v166_v8 }
 0x137   :  { %171 = vadd.xlane.f32.xlu0 %v170_v10  ;;  %v427_v10 = vld [vmem:[#allocation7 + $0x48] sm:$0xff] }
 0x138   :  { %v176_v12 = vsel %vm169_vm2, %v175_v11, 0.0  ;;  %v428_v11 = vld [vmem:[#allocation7 + $0x50] sm:$0xff] }
 0x139   :  { %v1276_v14 = vpack.c.bf16 %v429_v13, %v428_v11 }
 0x13b   :  { %177 = vadd.xlane.f32.xlu0 %v176_v12  ;;  %v1273_v12 = vpack.c.bf16 %v427_v10, %v426_v9  ;;  %v653_v9 = vld [vmem:[#allocation7 + $0x98] sm:$0xff] }
 0x1c4   :  { %v172_v19 = vpop.xlane.xlu0 %171 }
 0x1c5   :  { %v174_v20 = vmul.f32 0.03125, %v172_v19 }
 0x1c7   :  { %v180_v22 = vmul.f32 %v174_v20, %v174_v20  ;;  %v183_v27 = vsub.f32 %v166_v8, %v174_v20 }
 0x1c8   :  { %v178_v21 = vpop.xlane.xlu0 %177 }
 0x1c9   :  { %v179_v23 = vmul.f32 0.03125, %v178_v21 }
 0x1cb   :  { %v181_v24 = vsub.f32 %v179_v23, %v180_v22 }
 0x1cd   :  { %v182_v25 = vmax.f32 %v181_v24, 0.0 }
 0x1cf   :  { %v184_v26 = vadd.f32 1e-05, %v182_v25  ;;  %v1095_v25 = vld [vmem:[#allocation10 + $0xa] ss:$0 sm:$0xff] }
 0x1d1   :  { %1319 = vrsqrt.f32 %v184_v26 }
 0x1db   :  { %v1320_v28 = vpop.eup %1319 }
 0x1dc   :  { %v186_v30 = vmul.f32 %v1320_v28, %v183_v27  ;;  %v1096_v27 = vld [vmem:[#allocation10 + $0x12] ss:$0 sm:$0xff] }
 0x1de   :  { %v193_v32 = vmul.f32 %v1087_v29, %v186_v30 }
 0x1e0   :  { %v200_v33 = vadd.f32 %v1088_v31, %v193_v32  ;;  %v1097_v31 = vld [vmem:[#allocation10 + $0x3] ss:$0 sm:$0xff] }
 0x1e2   :  { %1321 = vtanh.f32 %v200_v33 }
 0x1ec   :  { %v1322_v34 = vpop.eup %1321 }
 0x1ed   :  { %1178 = vmatmul.mubr.msk.f32.vlgmr.msra.gmra.mrb[0].mxu1 %vm169_vm2, %v1322_v34 }
 0x1ee   :  { %1199 = vmatprep.mubr.msk.f32.mxu1 %vm1499_vm0, %v1500_v1  ;;  %1274 = vmatpush3.bf16.msra.mxu1 %v1273_v12 }
 0x1ef   :  { %1275 = vmatprep.subr.bf16.mxu1 %v1498_v0 }
 0x1f2   :  { %1277 = vmatpush3.bf16.msra.mxu1 %v1276_v14 }
 0x1f3   :  { %1284 = vmatprep.subr.bf16.mxu1 %v1498_v0 }
 0x2c0   :  { %v280_v36 = vpop.f32.mrb[0].mxu1 }
 0x2c1   :  { %v281_v37 = vadd.f32 %v1089_v35, %v280_v36  ;;  %v1179_v38 = vpop.f32.mrb[1].mxu1 }
 0x2c2   :  { %v538_v38 = vld [vmem:[#allocation7 + $0x60] sm:$0xff] }
 0x2c3   :  { %v284_v39 = vsel %vm169_vm2, %v281_v37, 0.0  ;;  %v288_v40 = vmul.f32 %v281_v37, %v281_v37 }
 0x2c4   :  { %285 = vadd.xlane.f32.xlu1 %v284_v39  ;;  %v539_v39 = vld [vmem:[#allocation7 + $0x68] sm:$0xff] }
 0x2c5   :  { %v289_v41 = vsel %vm169_vm2, %v288_v40, 0.0  ;;  %v540_v40 = vld [vmem:[#allocation7 + $0x70] sm:$0xff] }
 0x2c6   :  { %v1282_v43 = vpack.c.bf16 %v541_v42, %v540_v40 }
 0x2c8   :  { %290 = vadd.xlane.f32.xlu1 %v289_v41  ;;  %v1279_v41 = vpack.c.bf16 %v539_v39, %v538_v38  ;;  %v765_v38 = vld [vmem:[#allocation7 + $0xb8] sm:$0xff] }
 0x351   :  { %v286_v48 = vpop.xlane.xlu1 %285 }
 0x352   :  { %v287_v49 = vmul.f32 0.03125, %v286_v48 }
 0x354   :  { %v293_v51 = vmul.f32 %v287_v49, %v287_v49  ;;  %v296_v56 = vsub.f32 %v281_v37, %v287_v49 }
 0x355   :  { %v291_v50 = vpop.xlane.xlu1 %290 }
 0x356   :  { %v292_v52 = vmul.f32 0.03125, %v291_v50 }
 0x358   :  { %v294_v53 = vsub.f32 %v292_v52, %v293_v51 }
 0x35a   :  { %v295_v54 = vmax.f32 %v294_v53, 0.0 }
 0x35c   :  { %v297_v55 = vadd.f32 1e-05, %v295_v54  ;;  %v1099_v54 = vld [vmem:[#allocation10 + $0xb] ss:$0 sm:$0xff] }
 0x35e   :  { %1323 = vrsqrt.f32 %v297_v55 }
 0x368   :  { %v1324_v57 = vpop.eup %1323 }
 0x369   :  { %v299_v59 = vmul.f32 %v1324_v57, %v296_v56  ;;  %v1100_v56 = vld [vmem:[#allocation10 + $0x13] ss:$0 sm:$0xff] }
 0x36b   :  { %v305_v61 = vmul.f32 %v1091_v58, %v299_v59 }
 0x36d   :  { %v311_v62 = vadd.f32 %v1092_v60, %v305_v61  ;;  %v1101_v60 = vld [vmem:[#allocation10 + $0x4] ss:$0 sm:$0xff] }
 0x36f   :  { %1325 = vtanh.f32 %v311_v62 }
 0x379   :  { %v1326_v63 = vpop.eup %1325 }
 0x37a   :  { %1189 = vmatmul.mubr.msk.f32.vlgmr.msra.gmra.mrb[2].mxu0 %vm169_vm2, %v1326_v63 }
 0x37b   :  { %1210 = vmatprep.mubr.msk.f32.mxu0 %vm1499_vm0, %v1500_v1  ;;  %1280 = vmatpush3.bf16.msra.mxu0 %v1279_v41 }
 0x37c   :  { %1281 = vmatprep.subr.bf16.mxu0 %v1498_v0 }
 0x37f   :  { %1283 = vmatpush3.bf16.msra.mxu0 %v1282_v43 }
 0x380   :  { %1290 = vmatprep.subr.bf16.mxu0 %v1498_v0 }
 0x44d   :  { %v392_v3 = vpop.f32.mrb[2].mxu0 }
 0x44e   :  { %v393_v4 = vadd.f32 %v1093_v2, %v392_v3  ;;  %v1190_v5 = vpop.f32.mrb[3].mxu0 }
 0x44f   :  { %v650_v5 = vld [vmem:[#allocation7 + $0x80] sm:$0xff] }
 0x450   :  { %v396_v6 = vsel %vm169_vm2, %v393_v4, 0.0  ;;  %v400_v7 = vmul.f32 %v393_v4, %v393_v4 }
 0x451   :  { %397 = vadd.xlane.f32.xlu0 %v396_v6  ;;  %v651_v6 = vld [vmem:[#allocation7 + $0x88] sm:$0xff] }
 0x452   :  { %v401_v8 = vsel %vm169_vm2, %v400_v7, 0.0  ;;  %v652_v7 = vld [vmem:[#allocation7 + $0x90] sm:$0xff] }
 0x453   :  { %402 = vadd.xlane.f32.xlu1 %v401_v8  ;;  %v1285_v8 = vpack.c.bf16 %v651_v6, %v650_v5  ;;  %v1288_v10 = vpack.c.bf16 %v653_v9, %v652_v7  ;;  %v877_v5 = vld [vmem:[#allocation7 + $0xd8] sm:$0xff] }
 0x4de   :  { %v398_v15 = vpop.xlane.xlu0 %397 }
 0x4df   :  { %v399_v16 = vmul.f32 0.03125, %v398_v15 }
 0x4e0   :  { %v403_v17 = vpop.xlane.xlu1 %402 }
 0x4e1   :  { %v405_v18 = vmul.f32 %v399_v16, %v399_v16  ;;  %v404_v19 = vmul.f32 0.03125, %v403_v17  ;;  %v408_v23 = vsub.f32 %v393_v4, %v399_v16 }
 0x4e3   :  { %v406_v20 = vsub.f32 %v404_v19, %v405_v18 }
 0x4e5   :  { %v407_v21 = vmax.f32 %v406_v20, 0.0 }
 0x4e7   :  { %v409_v22 = vadd.f32 1e-05, %v407_v21  ;;  %v1103_v21 = vld [vmem:[#allocation10 + $0xc] ss:$0 sm:$0xff] }
 0x4e9   :  { %1327 = vrsqrt.f32 %v409_v22 }
 0x4f3   :  { %v1328_v24 = vpop.eup %1327 }
 0x4f4   :  { %v411_v26 = vmul.f32 %v1328_v24, %v408_v23  ;;  %v1104_v23 = vld [vmem:[#allocation10 + $0x14] ss:$0 sm:$0xff] }
 0x4f6   :  { %v417_v28 = vmul.f32 %v1095_v25, %v411_v26 }
 0x4f8   :  { %v423_v29 = vadd.f32 %v1096_v27, %v417_v28  ;;  %v1105_v27 = vld [vmem:[#allocation10 + $0x5] ss:$0 sm:$0xff] }
 0x4fa   :  { %1329 = vtanh.f32 %v423_v29 }
 0x504   :  { %v1330_v30 = vpop.eup %1329 }
 0x505   :  { %1200 = vmatmul.mubr.msk.f32.vlgmr.msra.gmra.mrb[2].mxu1 %vm169_vm2, %v1330_v30 }
 0x506   :  { %1221 = vmatprep.mubr.msk.f32.mxu1 %vm1499_vm0, %v1500_v1  ;;  %1286 = vmatpush3.bf16.msra.mxu1 %v1285_v8 }
 0x507   :  { %1287 = vmatprep.subr.bf16.mxu1 %v1498_v0 }
 0x50a   :  { %1289 = vmatpush3.bf16.msra.mxu1 %v1288_v10 }
 0x50b   :  { %1296 = vmatprep.subr.bf16.mxu1 %v1498_v0 }
 0x5d8   :  { %v504_v32 = vpop.f32.mrb[2].mxu1 }
 0x5d9   :  { %v505_v33 = vadd.f32 %v1097_v31, %v504_v32  ;;  %v1201_v34 = vpop.f32.mrb[3].mxu1 }
 0x5da   :  { %v762_v34 = vld [vmem:[#allocation7 + $0xa0] sm:$0xff] }
 0x5db   :  { %v508_v35 = vsel %vm169_vm2, %v505_v33, 0.0  ;;  %v512_v36 = vmul.f32 %v505_v33, %v505_v33 }
 0x5dc   :  { %509 = vadd.xlane.f32.xlu0 %v508_v35  ;;  %v763_v35 = vld [vmem:[#allocation7 + $0xa8] sm:$0xff] }
 0x5dd   :  { %v513_v37 = vsel %vm169_vm2, %v512_v36, 0.0  ;;  %v764_v36 = vld [vmem:[#allocation7 + $0xb0] sm:$0xff] }
 0x5de   :  { %514 = vadd.xlane.f32.xlu1 %v513_v37  ;;  %v1291_v37 = vpack.c.bf16 %v763_v35, %v762_v34  ;;  %v1294_v39 = vpack.c.bf16 %v765_v38, %v764_v36 }
 0x669   :  { %v510_v44 = vpop.xlane.xlu0 %509 }
 0x66a   :  { %v511_v45 = vmul.f32 0.03125, %v510_v44 }
 0x66b   :  { %v515_v46 = vpop.xlane.xlu1 %514 }
 0x66c   :  { %v517_v47 = vmul.f32 %v511_v45, %v511_v45  ;;  %v516_v48 = vmul.f32 0.03125, %v515_v46  ;;  %v520_v52 = vsub.f32 %v505_v33, %v511_v45 }
 0x66e   :  { %v518_v49 = vsub.f32 %v516_v48, %v517_v47 }
 0x670   :  { %v519_v50 = vmax.f32 %v518_v49, 0.0 }
 0x672   :  { %v521_v51 = vadd.f32 1e-05, %v519_v50  ;;  %v1107_v50 = vld [vmem:[#allocation10 + $0xd] ss:$0 sm:$0xff] }
 0x674   :  { %1331 = vrsqrt.f32 %v521_v51 }
 0x67e   :  { %v1332_v53 = vpop.eup %1331 }
 0x67f   :  { %v523_v55 = vmul.f32 %v1332_v53, %v520_v52  ;;  %v1108_v52 = vld [vmem:[#allocation10 + $0x15] ss:$0 sm:$0xff] }
 0x681   :  { %v529_v57 = vmul.f32 %v1099_v54, %v523_v55 }
 0x683   :  { %v535_v58 = vadd.f32 %v1100_v56, %v529_v57  ;;  %v1109_v56 = vld [vmem:[#allocation10 + $0x6] ss:$0 sm:$0xff] }
 0x685   :  { %1333 = vtanh.f32 %v535_v58 }
 0x68f   :  { %v1334_v59 = vpop.eup %1333 }
 0x690   :  { %1211 = vmatmul.mubr.msk.f32.vlgmr.msra.gmra.mrb[4].mxu0 %vm169_vm2, %v1334_v59 }
 0x691   :  { %1232 = vmatprep.mubr.msk.f32.mxu0 %vm1499_vm0, %v1500_v1  ;;  %1292 = vmatpush3.bf16.msra.mxu0 %v1291_v37 }
 0x692   :  { %1293 = vmatprep.subr.bf16.mxu0 %v1498_v0 }
 0x695   :  { %1295 = vmatpush3.bf16.msra.mxu0 %v1294_v39 }
 0x696   :  { %1302 = vmatprep.subr.bf16.mxu0 %v1498_v0 }
 0x763   :  { %v616_v61 = vpop.f32.mrb[4].mxu0 }
 0x764   :  { %v617_v62 = vadd.f32 %v1101_v60, %v616_v61  ;;  %v1212_v63 = vpop.f32.mrb[5].mxu0 }
 0x765   :  { %v874_v63 = vld [vmem:[#allocation7 + $0xc0] sm:$0xff] }
 0x766   :  { %v620_v2 = vsel %vm169_vm2, %v617_v62, 0.0  ;;  %v624_v3 = vmul.f32 %v617_v62, %v617_v62 }
 0x767   :  { %621 = vadd.xlane.f32.xlu0 %v620_v2  ;;  %v875_v2 = vld [vmem:[#allocation7 + $0xc8] sm:$0xff] }
 0x768   :  { %v625_v4 = vsel %vm169_vm2, %v624_v3, 0.0  ;;  %v876_v3 = vld [vmem:[#allocation7 + $0xd0] sm:$0xff] }
 0x769   :  { %626 = vadd.xlane.f32.xlu1 %v625_v4  ;;  %v1297_v4 = vpack.c.bf16 %v875_v2, %v874_v63  ;;  %v1300_v6 = vpack.c.bf16 %v877_v5, %v876_v3 }
 0x7f4   :  { %v622_v11 = vpop.xlane.xlu0 %621 }
 0x7f5   :  { %v623_v12 = vmul.f32 0.03125, %v622_v11 }
 0x7f6   :  { %v627_v13 = vpop.xlane.xlu1 %626 }
 0x7f7   :  { %v629_v14 = vmul.f32 %v623_v12, %v623_v12  ;;  %v628_v15 = vmul.f32 0.03125, %v627_v13  ;;  %v632_v19 = vsub.f32 %v617_v62, %v623_v12 }
 0x7f9   :  { %v630_v16 = vsub.f32 %v628_v15, %v629_v14 }
 0x7fb   :  { %v631_v17 = vmax.f32 %v630_v16, 0.0  ;;  %v1111_v16 = vld [vmem:[#allocation10 + $0xe] ss:$0 sm:$0xff] }
 0x7fd   :  { %v633_v18 = vadd.f32 1e-05, %v631_v17 }
 0x7ff   :  { %1335 = vrsqrt.f32 %v633_v18  ;;  %v1112_v18 = vld [vmem:[#allocation10 + $0x16] ss:$0 sm:$0xff] }
 0x809   :  { %v1336_v20 = vpop.eup %1335 }
 0x80a   :  { %v635_v22 = vmul.f32 %v1336_v20, %v632_v19 }
 0x80c   :  { %v641_v24 = vmul.f32 %v1103_v21, %v635_v22  ;;  %v1113_v22 = vld [vmem:[#allocation10 + $0x7] ss:$0 sm:$0xff] }
 0x80e   :  { %v647_v25 = vadd.f32 %v1104_v23, %v641_v24 }
 0x810   :  { %1337 = vtanh.f32 %v647_v25 }
 0x81a   :  { %v1338_v26 = vpop.eup %1337 }
 0x81b   :  { %1222 = vmatmul.mubr.msk.f32.vlgmr.msra.gmra.mrb[4].mxu1 %vm169_vm2, %v1338_v26 }
 0x81c   :  { %1243 = vmatprep.mubr.msk.f32.mxu1 %vm1499_vm0, %v1500_v1  ;;  %1298 = vmatpush3.bf16.msra.mxu1 %v1297_v4 }
 0x81d   :  { %1299 = vmatprep.subr.bf16.mxu1 %v1498_v0 }
 0x820   :  { %1301 = vmatpush3.bf16.msra.mxu1 %v1300_v6 }
 0x8ee   :  { %v728_v28 = vpop.f32.mrb[4].mxu1 }
 0x8ef   :  { %v729_v29 = vadd.f32 %v1105_v27, %v728_v28  ;;  %v1223_v30 = vpop.f32.mrb[5].mxu1 }
 0x8f0   :  { %v986_v30 = vld [vmem:[#allocation8 + $0x8] sm:$0xff] }
 0x8f1   :  { %v732_v31 = vsel %vm169_vm2, %v729_v29, 0.0  ;;  %v736_v32 = vmul.f32 %v729_v29, %v729_v29 }
 0x8f2   :  { %733 = vadd.xlane.f32.xlu0 %v732_v31  ;;  %v987_v31 = vld [vmem:[#allocation8 + $0x10] sm:$0xff] }
 0x8f3   :  { %v737_v33 = vsel %vm169_vm2, %v736_v32, 0.0 }
 0x8f4   :  { %738 = vadd.xlane.f32.xlu1 %v737_v33  ;;  %v988_v33 = vld [vmem:[#allocation8 + $0x18] sm:$0xff] }
 0x8f5   :  { %v1306_v34 = vpack.c.bf16 %v988_v33, %v987_v31 }
 0x97f   :  { %v734_v40 = vpop.xlane.xlu0 %733 }
 0x980   :  { %v735_v41 = vmul.f32 0.03125, %v734_v40 }
 0x981   :  { %v739_v42 = vpop.xlane.xlu1 %738 }
 0x982   :  { %v741_v43 = vmul.f32 %v735_v41, %v735_v41  ;;  %v740_v44 = vmul.f32 0.03125, %v739_v42  ;;  %v744_v48 = vsub.f32 %v729_v29, %v735_v41  ;;  %v985_v29 = vld [vmem:[#allocation8] sm:$0xff] }
 0x983   :  { %v1303_v32 = vpack.c.bf16 %v986_v30, %v985_v29 }
 0x984   :  { %v742_v45 = vsub.f32 %v740_v44, %v741_v43 }
 0x986   :  { %v743_v46 = vmax.f32 %v742_v45, 0.0  ;;  %v1115_v45 = vld [vmem:[#allocation10 + $0xf] ss:$0 sm:$0xff] }
 0x988   :  { %v745_v47 = vadd.f32 1e-05, %v743_v46 }
 0x98a   :  { %1339 = vrsqrt.f32 %v745_v47  ;;  %v1116_v47 = vld [vmem:[#allocation10 + $0x17] ss:$0 sm:$0xff] }
 0x994   :  { %v1340_v49 = vpop.eup %1339 }
 0x995   :  { %v747_v51 = vmul.f32 %v1340_v49, %v744_v48 }
 0x997   :  { %v753_v53 = vmul.f32 %v1107_v50, %v747_v51 }
 0x999   :  { %v759_v54 = vadd.f32 %v1108_v52, %v753_v53 }
 0x99b   :  { %1341 = vtanh.f32 %v759_v54 }
 0x9a5   :  { %v1342_v55 = vpop.eup %1341 }
 0x9a6   :  { %1233 = vmatmul.mubr.msk.f32.vlgmr.msra.gmra.mrb[6].mxu0 %vm169_vm2, %v1342_v55 }
 0x9a7   :  { %1254 = vmatprep.mubr.msk.f32.mxu0 %vm1499_vm0, %v1500_v1  ;;  %1304 = vmatpush3.bf16.msra.mxu0 %v1303_v32 }
 0x9a8   :  { %1305 = vmatprep.subr.bf16.mxu0 %v1498_v0  ;;  %v1117_v0 = vld [vmem:[#allocation8 + $0x20] ss:$0 sm:$0xff] }
 0x9ab   :  { %1307 = vmatpush3.bf16.msra.mxu0 %v1306_v34 }
 0xa79   :  { %v840_v57 = vpop.f32.mrb[6].mxu0 }
 0xa7a   :  { %v841_v58 = vadd.f32 %v1109_v56, %v840_v57  ;;  %v1234_v59 = vpop.f32.mrb[7].mxu0 }
 0xa7c   :  { %v844_v60 = vsel %vm169_vm2, %v841_v58, 0.0  ;;  %v848_v61 = vmul.f32 %v841_v58, %v841_v58 }
 0xa7d   :  { %845 = vadd.xlane.f32.xlu0 %v844_v60 }
 0xa7e   :  { %v849_v62 = vsel %vm169_vm2, %v848_v61, 0.0 }
 0xa7f   :  { %850 = vadd.xlane.f32.xlu1 %v849_v62 }
 0xb0a   :  { %v846_v1 = vpop.xlane.xlu0 %845 }
 0xb0b   :  { %v847_v7 = vmul.f32 0.03125, %v846_v1 }
 0xb0c   :  { %v851_v8 = vpop.xlane.xlu1 %850 }
 0xb0d   :  { %v853_v9 = vmul.f32 %v847_v7, %v847_v7  ;;  %v852_v10 = vmul.f32 0.03125, %v851_v8  ;;  %v856_v14 = vsub.f32 %v841_v58, %v847_v7 }
 0xb0f   :  { %v854_v11 = vsub.f32 %v852_v10, %v853_v9 }
 0xb11   :  { %v855_v12 = vmax.f32 %v854_v11, 0.0 }
 0xb13   :  { %v857_v13 = vadd.f32 1e-05, %v855_v12 }
 0xb15   :  { %1343 = vrsqrt.f32 %v857_v13 }
 0xb1f   :  { %v1344_v15 = vpop.eup %1343 }
 0xb20   :  { %v859_v17 = vmul.f32 %v1344_v15, %v856_v14 }
 0xb22   :  { %v865_v19 = vmul.f32 %v1111_v16, %v859_v17 }
 0xb24   :  { %v871_v20 = vadd.f32 %v1112_v18, %v865_v19 }
 0xb26   :  { %1345 = vtanh.f32 %v871_v20 }
 0xb30   :  { %v1346_v21 = vpop.eup %1345 }
 0xb31   :  { %1244 = vmatmul.mubr.msk.f32.vlgmr.msra.gmra.mrb[6].mxu1 %vm169_vm2, %v1346_v21 }
 0xc04   :  { %v952_v23 = vpop.f32.mrb[6].mxu1 }
 0xc05   :  { %v953_v24 = vadd.f32 %v1113_v22, %v952_v23  ;;  %v1245_v25 = vpop.f32.mrb[7].mxu1 }
 0xc07   :  { %v956_v26 = vsel %vm169_vm2, %v953_v24, 0.0  ;;  %v960_v27 = vmul.f32 %v953_v24, %v953_v24 }
 0xc08   :  { %957 = vadd.xlane.f32.xlu0 %v956_v26 }
 0xc09   :  { %v961_v28 = vsel %vm169_vm2, %v960_v27, 0.0 }
 0xc0a   :  { %962 = vadd.xlane.f32.xlu1 %v961_v28 }
 0xc95   :  { %v958_v35 = vpop.xlane.xlu0 %957 }
 0xc96   :  { %v959_v36 = vmul.f32 0.03125, %v958_v35 }
 0xc97   :  { %v963_v37 = vpop.xlane.xlu1 %962 }
 0xc98   :  { %v965_v38 = vmul.f32 %v959_v36, %v959_v36  ;;  %v964_v39 = vmul.f32 0.03125, %v963_v37  ;;  %v968_v43 = vsub.f32 %v953_v24, %v959_v36 }
 0xc9a   :  { %v966_v40 = vsub.f32 %v964_v39, %v965_v38 }
 0xc9c   :  { %v967_v41 = vmax.f32 %v966_v40, 0.0 }
 0xc9e   :  { %v969_v42 = vadd.f32 1e-05, %v967_v41 }
 0xca0   :  { %1347 = vrsqrt.f32 %v969_v42 }
 0xcaa   :  { %v1348_v44 = vpop.eup %1347 }
 0xcab   :  { %v971_v46 = vmul.f32 %v1348_v44, %v968_v43 }
 0xcad   :  { %v977_v48 = vmul.f32 %v1115_v45, %v971_v46 }
 0xcaf   :  { %v983_v49 = vadd.f32 %v1116_v47, %v977_v48 }
 0xcb1   :  { %1349 = vtanh.f32 %v983_v49 }
 0xcbb   :  { %v1350_v50 = vpop.eup %1349 }
 0xcbc   :  { %1255 = vmatmul.mubr.msk.f32.vlgmr.msra.gmra.mrb[8].mxu0 %vm169_vm2, %v1350_v50 }
 0xd8f   :  { %v1063_v51 = vpop.f32.mrb[8].mxu0 }
 0xd90   :  { %v1064_v52 = vadd.f32 %v1117_v0, %v1063_v51  ;;  %v1256_v53 = vpop.f32.mrb[9].mxu0 }
 0xd92   :  { %1067 = vst [vmem:[#allocation11] sm:$0xff] %v1064_v52 }
 0xd93   :  { %1472 = shalt.err (!%p1469_p2)
}
 0xd94   :  { %s1473_s30 = scalar_lea.hbm %s1680_s5, 128 }
 0xd95   :  { %p1474_p3 = scmp.ne.s32.totalorder %s1680_s5, %s1473_s30  ;;  %p1477_p4 = scmp.lt.u32.totalorder %s1473_s30, %s1680_s5 }
 0xd97   :  { %p1479_p5 = pnand %p1477_p4, %p1474_p3 }
 0xd99   :  { %1482 = shalt.err (!%p1479_p5)
}
 0xd9a   :  { %1077 = dma.vmem_to_hbm [thread:$0]  %s1075_s28, 128, %s1680_s5, [#allocation4]  }
 0xd9b   :  { %1489 = dma.done.wait [#allocation4], 128  }
 0xd9c   :  { %1490 = vsyncadd [#allocation4], 4294967168 }
 0xd9d   :  { %1081 = vsyncpa [#allocation3], 1 }
 0xd9e   :  { %1082 = vsyncpa [#allocation6], 1 }
 0xd9f   :  { %1083 = vsyncpa [#allocation9], 1 }
 0xda0   :  { %1084 = vsyncpa [#allocation4], 1 }

</bundles_post_ra>
